<compile_context>
chip_gen: v5e
topology: v5e:2x2
jax: 0.10.0
libtpu: 0.0.40
codegen_flags: <defaults>
</compile_context>

<pallas_src>
import functools

import jax
import jax.numpy as jnp
from jax.experimental import pallas as pl
from jax.experimental.pallas import tpu as pltpu

BETA = 0.5
CE_RATIO = 0.5

_LANE = 128                     # lanes (fast axis)
_TR_MAX = 1024                  # max sublane rows per tile (1024x128 f32 = 512 KiB / stream)
_MIN_PALLAS_ELEMS = 1 << 16     # below this a fused jnp reduction is strictly faster


def _combo_kernel(x_ref, t_ref, o_ref, acc_inter, acc_xt, acc_ce, *, beta, eps):
    i = pl.program_id(1)

    @pl.when(i == 0)
    def _init():
        acc_inter[...] = jnp.zeros_like(acc_inter)
        acc_xt[...] = jnp.zeros_like(acc_xt)
        acc_ce[...] = jnp.zeros_like(acc_ce)

    x = x_ref[...].astype(jnp.float32)
    t = t_ref[...].astype(jnp.float32)

    xc = jnp.clip(x, eps, 1.0 - eps)
    # Merged BCE accumulator: t*log(xc) + (1-beta)*(1-t)*log(1-xc).
    ce = t * jnp.log(xc) + (1.0 - beta) * ((1.0 - t) * jnp.log(1.0 - xc))

    # Pure VPU elementwise accumulation; cross-lane reduction only at finalize.
    acc_inter[...] += x * t
    acc_xt[...] += x + t
    acc_ce[...] += ce

    @pl.when(i == pl.num_programs(1) - 1)
    def _finalize():
        s_inter = jnp.sum(acc_inter[...])
        s_xt = jnp.sum(acc_xt[...])
        s_ce = jnp.sum(acc_ce[...])
        # Lane-dense vectorized store: pack the 3 per-split partial sums into
        # rows 0..2 of an (8, 128) block (no scalar stores).
        row_id = jax.lax.broadcasted_iota(jnp.int32, (8, _LANE), 0)
        vals = jnp.where(row_id == 0, s_inter,
               jnp.where(row_id == 1, s_xt,
               jnp.where(row_id == 2, s_ce, 0.0)))
        o_ref[...] = vals[None, :, :]


def _partial_sums(xf, tf, beta, eps):
    """Fused jnp partial sums (used for tails and the small-input fallback)."""
    xf = jnp.reshape(xf, (-1,)).astype(jnp.float32)
    tf = jnp.reshape(tf, (-1,)).astype(jnp.float32)
    inter = jnp.sum(xf * tf)
    xt = jnp.sum(xf + tf)
    xc = jnp.clip(xf, eps, 1.0 - eps)
    ce = jnp.sum(tf * jnp.log(xc) + (1.0 - beta) * ((1.0 - tf) * jnp.log(1.0 - xc)))
    return inter, xt, ce


def _combine(s_inter, s_xt, s_ce, n, cd_ratio, smooth, beta):
    dice = (2.0 * s_inter + smooth) / (s_xt + smooth)
    weighted_ce = -(beta * s_ce) / n          # mean of -(beta*(...)) over n elements
    return cd_ratio * weighted_ce - (1.0 - cd_ratio) * dice


def _num_tensorcores():
    # v7x has 2 TensorCores per chip; v5e/v6e have 1.  Fail safe to 1.
    try:
        kind = jax.devices()[0].device_kind.lower()
    except Exception:
        return 1
    return 2 if ("v7" in kind or "tpu7" in kind) else 1


def combo_loss(ind, tar, cd_ratio=CE_RATIO, smooth=1.0, beta=BETA, eps=1e-9,
               use_pallas=None):
    x = jnp.reshape(ind, (-1,))
    t = jnp.reshape(tar, (-1,))
    n = x.shape[0]
    beta = float(beta)
    eps = float(eps)

    if use_pallas is None:
        use_pallas = n >= _MIN_PALLAS_ELEMS

    # Sublane alignment for the block: 8 rows for 4-byte, 16 for 2-byte,
    # 32 for 1-byte input dtypes (use the stricter of the two streams).
    itemsize = min(jnp.dtype(x.dtype).itemsize, jnp.dtype(t.dtype).itemsize)
    row_align = max(8, 32 // max(1, itemsize))

    aligned_rows = n // _LANE               # complete 128-lane rows
    if (not use_pallas) or aligned_rows < row_align:
        si, sx, sc = _partial_sums(x, t, beta, eps)
        return _combine(si, sx, sc, n, cd_ratio, smooth, beta)

    n_tc = _num_tensorcores()
    n_splits = n_tc if aligned_rows >= n_tc * row_align else 1
    spc = pl.cdiv(aligned_rows, n_splits * _TR_MAX)      # "arbitrary" steps / split
    tile_rows = (aligned_rows // (n_splits * spc)) // row_align * row_align
    if tile_rows < row_align:                            # degenerate: jnp wins
        si, sx, sc = _partial_sums(x, t, beta, eps)
        return _combine(si, sx, sc, n, cd_ratio, smooth, beta)

    main_rows = n_splits * spc * tile_rows               # rows covered by the kernel
    aligned_elems = aligned_rows * _LANE

    if n == aligned_elems:
        # Contiguous flattened array: reshape is a free bitcast, no HBM copy.
        x2d = x.reshape(aligned_rows, _LANE)
        t2d = t.reshape(aligned_rows, _LANE)
        x_frag = t_frag = None
    else:
        # n not a multiple of 128: one prefix-slice copy of the aligned part
        # (unavoidable without manual 1-D DMA); the <128-element fragment is
        # reduced in jnp below.
        x2d = x[:aligned_elems].reshape(aligned_rows, _LANE)
        t2d = t[:aligned_elems].reshape(aligned_rows, _LANE)
        x_frag = x[aligned_elems:]
        t_frag = t[aligned_elems:]

    kernel = functools.partial(_combo_kernel, beta=beta, eps=eps)

    # 2 input streams x 2 pipeline buffers + 3 f32 accumulators (+ headroom).
    in_bytes = tile_rows * _LANE * (x2d.dtype.itemsize + t2d.dtype.itemsize)
    acc_bytes = 3 * tile_rows * _LANE * 4
    vmem_limit = int(min(48 << 20, max(16 << 20, 2 * in_bytes + acc_bytes + (2 << 20))))

    parts = pl.pallas_call(
        kernel,
        out_shape=jax.ShapeDtypeStruct((n_splits, 8, _LANE), jnp.float32),
        grid_spec=pltpu.PrefetchScalarGridSpec(
            num_scalar_prefetch=0,
            grid=(n_splits, spc),
            in_specs=[
                pl.BlockSpec((tile_rows, _LANE), lambda c, i: (c * spc + i, 0)),
                pl.BlockSpec((tile_rows, _LANE), lambda c, i: (c * spc + i, 0)),
            ],
            out_specs=pl.BlockSpec((1, 8, _LANE), lambda c, i: (c, 0, 0)),
            scratch_shapes=[pltpu.VMEM((tile_rows, _LANE), jnp.float32)] * 3,
        ),
        compiler_params=pltpu.CompilerParams(
            dimension_semantics=("parallel", "arbitrary"),
            vmem_limit_bytes=vmem_limit),
    )(x2d, t2d)

    s = jnp.sum(parts[:, :3, 0], axis=0)     # [intersection, sum(x)+sum(t), bce]
    s_inter, s_xt, s_ce = s[0], s[1], s[2]

    # Ragged remainder: rows not covered by whole tiles + sub-128 fragment,
    # reduced with a tiny fused jnp pass and folded into the partial sums.
    if main_rows < aligned_rows:
        ri, rx, rc = _partial_sums(x2d[main_rows:], t2d[main_rows:], beta, eps)
        s_inter, s_xt, s_ce = s_inter + ri, s_xt + rx, s_ce + rc
    if x_frag is not None:
        fi, fx, fc = _partial_sums(x_frag, t_frag, beta, eps)
        s_inter, s_xt, s_ce = s_inter + fi, s_xt + fx, s_ce + fc

    return _combine(s_inter, s_xt, s_ce, n, cd_ratio, smooth, beta)


def _combo_loss_ref(ind, tar, cd_ratio=CE_RATIO, smooth=1.0, beta=BETA, eps=1e-9):
    # Direct transcription of the PyTorch module, in plain jnp.
    inputs = jnp.reshape(ind, (-1,)).astype(jnp.float32)
    targets = jnp.reshape(tar, (-1,)).astype(jnp.float32)
    intersection = jnp.sum(inputs * targets)
    dice = (2.0 * intersection + smooth) / (jnp.sum(inputs) + jnp.sum(targets) + smooth)
    inputs = jnp.clip(inputs, eps, 1.0 - eps)
    out = -(beta * (targets * jnp.log(inputs)
                    + (1.0 - beta) * (1.0 - targets) * jnp.log(1.0 - inputs)))
    weighted_ce = jnp.mean(out)
    return cd_ratio * weighted_ce - (1.0 - cd_ratio) * dice


if __name__ == "__main__":
    key = jax.random.PRNGKey(0)
    ks = jax.random.split(key, 6)

    def _check(got, ref, tol=1e-5):
        assert jnp.allclose(got, ref, atol=tol, rtol=tol), (got, ref)

    # 1) Small NCHW shape from the module's usage, forced through the kernel.
    ind = jax.random.uniform(ks[0], (2, 4, 16, 16), jnp.float32, 0.01, 0.99)
    tar = (jax.random.uniform(ks[1], (2, 4, 16, 16)) > 0.5).astype(jnp.float32)
    loss = combo_loss(ind, tar, use_pallas=True)
    jax.block_until_ready(loss)
    _check(loss, _combo_loss_ref(ind, tar))

    # 1b) Same inputs through the auto path (small-input jnp short-circuit).
    _check(combo_loss(ind, tar), _combo_loss_ref(ind, tar))

    # 2) Larger f32 input: multi-step accumulation, 128-aligned zero-copy path.
    ind2 = jax.random.uniform(ks[2], (2, 8, 128, 128), jnp.float32, 0.01, 0.99)
    tar2 = (jax.random.uniform(ks[3], (2, 8, 128, 128)) > 0.5).astype(jnp.float32)
    loss2 = combo_loss(ind2, tar2)
    jax.block_until_ready(loss2)
    _check(loss2, _combo_loss_ref(ind2, tar2))

    # 3) bf16 inputs: half the HBM traffic, widened to f32 inside the kernel.
    ind3 = ind2.astype(jnp.bfloat16)
    tar3 = tar2.astype(jnp.bfloat16)
    loss3 = combo_loss(ind3, tar3)
    jax.block_until_ready(loss3)
    _check(loss3, _combo_loss_ref(ind3, tar3), tol=1e-4)

    # 4) Non-128-aligned element count: exercises the ragged-tail handling.
    ind4 = jax.random.uniform(ks[4], (3, 5, 97, 113), jnp.float32, 0.01, 0.99)
    tar4 = (jax.random.uniform(ks[5], (3, 5, 97, 113)) > 0.5).astype(jnp.float32)
    loss4 = combo_loss(ind4, tar4)
    jax.block_until_ready(loss4)
    _check(loss4, _combo_loss_ref(ind4, tar4))

    print("KERNEL_OK")
</pallas_src>

<mosaic_0001>
module attributes {stable_mosaic.version = 11 : i64} {
  func.func @_combo_kernel(%arg0: i32, %arg1: i32, %arg2: memref<16x128xf32, #tpu.memory_space<vmem>>, %arg3: memref<16x128xf32, #tpu.memory_space<vmem>>, %arg4: memref<1x8x128xf32, #tpu.memory_space<vmem>>, %arg5: memref<16x128xf32, #tpu.memory_space<vmem>>, %arg6: memref<16x128xf32, #tpu.memory_space<vmem>>, %arg7: memref<16x128xf32, #tpu.memory_space<vmem>>) attributes {dimension_semantics = [#tpu.dimension_semantics<parallel>, #tpu.dimension_semantics<arbitrary>], iteration_bounds = array<i64: 1, 1>, scalar_prefetch = 0 : i64, scratch_operands = 3 : i64, tpu.core_type = #tpu.core_type<tc>, window_params = [{transform_indices = @transform_0, window_bounds = array<i64: 16, 128>}, {transform_indices = @transform_1, window_bounds = array<i64: 16, 128>}, {transform_indices = @transform_2, window_bounds = array<i64: 1, 8, 128>}]} {
    %c0_i32 = arith.constant 0 : i32
    %0 = arith.cmpi eq, %arg1, %c0_i32 : i32
    %1 = arith.extui %0 : i1 to i32
    %c0_i32_0 = arith.constant 0 : i32
    %2 = arith.cmpi ne, %1, %c0_i32_0 : i32
    scf.if %2 {
      %cst_22 = arith.constant 0.000000e+00 : f32
      %34 = vector.broadcast %cst_22 : f32 to vector<16x128xf32>
      %c0_23 = arith.constant 0 : index
      %c0_24 = arith.constant 0 : index
      %35 = vector.load %arg5[%c0_23, %c0_24] : memref<16x128xf32, #tpu.memory_space<vmem>>, vector<16x128xf32>
      tpu.vector_store %arg5[%c0_23, %c0_24], %34 {strides = array<i32>} : memref<16x128xf32, #tpu.memory_space<vmem>>, vector<16x128xf32>,
      %cst_25 = arith.constant 0.000000e+00 : f32
      %36 = vector.broadcast %cst_25 : f32 to vector<16x128xf32>
      %c0_26 = arith.constant 0 : index
      %c0_27 = arith.constant 0 : index
      %37 = vector.load %arg6[%c0_26, %c0_27] : memref<16x128xf32, #tpu.memory_space<vmem>>, vector<16x128xf32>
      tpu.vector_store %arg6[%c0_26, %c0_27], %36 {strides = array<i32>} : memref<16x128xf32, #tpu.memory_space<vmem>>, vector<16x128xf32>,
      %cst_28 = arith.constant 0.000000e+00 : f32
      %38 = vector.broadcast %cst_28 : f32 to vector<16x128xf32>
      %c0_29 = arith.constant 0 : index
      %c0_30 = arith.constant 0 : index
      %39 = vector.load %arg7[%c0_29, %c0_30] : memref<16x128xf32, #tpu.memory_space<vmem>>, vector<16x128xf32>
      tpu.vector_store %arg7[%c0_29, %c0_30], %38 {strides = array<i32>} : memref<16x128xf32, #tpu.memory_space<vmem>>, vector<16x128xf32>,
    } else {
    }
    %c0 = arith.constant 0 : index
    %c0_1 = arith.constant 0 : index
    %3 = vector.load %arg2[%c0, %c0_1] : memref<16x128xf32, #tpu.memory_space<vmem>>, vector<16x128xf32>
    %c0_2 = arith.constant 0 : index
    %c0_3 = arith.constant 0 : index
    %4 = vector.load %arg3[%c0_2, %c0_3] : memref<16x128xf32, #tpu.memory_space<vmem>>, vector<16x128xf32>
    %cst = arith.constant 9.99999971E-10 : f32
    %cst_4 = arith.constant 1.000000e+00 : f32
    %5 = vector.broadcast %cst : f32 to vector<16x128xf32>
    %6 = arith.maximumf %5, %3 : vector<16x128xf32>
    %7 = vector.broadcast %cst_4 : f32 to vector<16x128xf32>
    %8 = arith.minimumf %7, %6 : vector<16x128xf32>
    %9 = math.log %8 : vector<16x128xf32>
    %10 = arith.mulf %4, %9 : vector<16x128xf32>
    %cst_5 = arith.constant 1.000000e+00 : f32
    %11 = vector.broadcast %cst_5 : f32 to vector<16x128xf32>
    %12 = arith.subf %11, %4 : vector<16x128xf32>
    %cst_6 = arith.constant 1.000000e+00 : f32
    %13 = vector.broadcast %cst_6 : f32 to vector<16x128xf32>
    %14 = arith.subf %13, %8 : vector<16x128xf32>
    %15 = math.log %14 : vector<16x128xf32>
    %16 = arith.mulf %12, %15 : vector<16x128xf32>
    %cst_7 = arith.constant 5.000000e-01 : f32
    %17 = vector.broadcast %cst_7 : f32 to vector<16x128xf32>
    %18 = arith.mulf %17, %16 : vector<16x128xf32>
    %19 = arith.addf %10, %18 : vector<16x128xf32>
    %c0_8 = arith.constant 0 : index
    %c0_9 = arith.constant 0 : index
    %20 = vector.load %arg5[%c0_8, %c0_9] : memref<16x128xf32, #tpu.memory_space<vmem>>, vector<16x128xf32>
    %21 = arith.mulf %3, %4 : vector<16x128xf32>
    %22 = arith.addf %20, %21 : vector<16x128xf32>
    %c0_10 = arith.constant 0 : index
    %c0_11 = arith.constant 0 : index
    %23 = vector.load %arg5[%c0_10, %c0_11] : memref<16x128xf32, #tpu.memory_space<vmem>>, vector<16x128xf32>
    tpu.vector_store %arg5[%c0_10, %c0_11], %22 {strides = array<i32>} : memref<16x128xf32, #tpu.memory_space<vmem>>, vector<16x128xf32>,
    %c0_12 = arith.constant 0 : index
    %c0_13 = arith.constant 0 : index
    %24 = vector.load %arg6[%c0_12, %c0_13] : memref<16x128xf32, #tpu.memory_space<vmem>>, vector<16x128xf32>
    %25 = arith.addf %3, %4 : vector<16x128xf32>
    %26 = arith.addf %24, %25 : vector<16x128xf32>
    %c0_14 = arith.constant 0 : index
    %c0_15 = arith.constant 0 : index
    %27 = vector.load %arg6[%c0_14, %c0_15] : memref<16x128xf32, #tpu.memory_space<vmem>>, vector<16x128xf32>
    tpu.vector_store %arg6[%c0_14, %c0_15], %26 {strides = array<i32>} : memref<16x128xf32, #tpu.memory_space<vmem>>, vector<16x128xf32>,
    %c0_16 = arith.constant 0 : index
    %c0_17 = arith.constant 0 : index
    %28 = vector.load %arg7[%c0_16, %c0_17] : memref<16x128xf32, #tpu.memory_space<vmem>>, vector<16x128xf32>
    %29 = arith.addf %28, %19 : vector<16x128xf32>
    %c0_18 = arith.constant 0 : index
    %c0_19 = arith.constant 0 : index
    %30 = vector.load %arg7[%c0_18, %c0_19] : memref<16x128xf32, #tpu.memory_space<vmem>>, vector<16x128xf32>
    tpu.vector_store %arg7[%c0_18, %c0_19], %29 {strides = array<i32>} : memref<16x128xf32, #tpu.memory_space<vmem>>, vector<16x128xf32>,
    %c0_i32_20 = arith.constant 0 : i32
    %31 = arith.cmpi eq, %arg1, %c0_i32_20 : i32
    %32 = arith.extui %31 : i1 to i32
    %c0_i32_21 = arith.constant 0 : i32
    %33 = arith.cmpi ne, %32, %c0_i32_21 : i32
    scf.if %33 {
      %c0_22 = arith.constant 0 : index
      %c0_23 = arith.constant 0 : index
      %34 = vector.load %arg5[%c0_22, %c0_23] : memref<16x128xf32, #tpu.memory_space<vmem>>, vector<16x128xf32>
      %35 = vector.shape_cast %34 : vector<16x128xf32> to vector<1x16x128xf32>
      %cst_24 = arith.constant dense<0.000000e+00> : vector<1xf32>
      %36 = vector.multi_reduction <add>, %35, %cst_24 [1, 2] : vector<1x16x128xf32> to vector<1xf32>
      %37 = vector.shape_cast %36 : vector<1xf32> to vector<1x1x1xf32>
      %38 = vector.extract %37[0, 0, 0] : f32 from vector<1x1x1xf32>
      %c0_25 = arith.constant 0 : index
      %c0_26 = arith.constant 0 : index
      %39 = vector.load %arg6[%c0_25, %c0_26] : memref<16x128xf32, #tpu.memory_space<vmem>>, vector<16x128xf32>
      %40 = vector.shape_cast %39 : vector<16x128xf32> to vector<1x16x128xf32>
      %cst_27 = arith.constant dense<0.000000e+00> : vector<1xf32>
      %41 = vector.multi_reduction <add>, %40, %cst_27 [1, 2] : vector<1x16x128xf32> to vector<1xf32>
      %42 = vector.shape_cast %41 : vector<1xf32> to vector<1x1x1xf32>
      %43 = vector.extract %42[0, 0, 0] : f32 from vector<1x1x1xf32>
      %c0_28 = arith.constant 0 : index
      %c0_29 = arith.constant 0 : index
      %44 = vector.load %arg7[%c0_28, %c0_29] : memref<16x128xf32, #tpu.memory_space<vmem>>, vector<16x128xf32>
      %45 = vector.shape_cast %44 : vector<16x128xf32> to vector<1x16x128xf32>
      %cst_30 = arith.constant dense<0.000000e+00> : vector<1xf32>
      %46 = vector.multi_reduction <add>, %45, %cst_30 [1, 2] : vector<1x16x128xf32> to vector<1xf32>
      %47 = vector.shape_cast %46 : vector<1xf32> to vector<1x1x1xf32>
      %48 = vector.extract %47[0, 0, 0] : f32 from vector<1x1x1xf32>
      %49 = tpu.iota {dimensions = array<i32: 0>} : vector<8x128xi32>
      %c0_i32_31 = arith.constant 0 : i32
      %50 = vector.broadcast %c0_i32_31 : i32 to vector<8x128xi32>
      %51 = arith.cmpi eq, %49, %50 : vector<8x128xi32>
      %c1_i32 = arith.constant 1 : i32
      %52 = vector.broadcast %c1_i32 : i32 to vector<8x128xi32>
      %53 = arith.cmpi eq, %49, %52 : vector<8x128xi32>
      %c2_i32 = arith.constant 2 : i32
      %54 = vector.broadcast %c2_i32 : i32 to vector<8x128xi32>
      %55 = arith.cmpi eq, %49, %54 : vector<8x128xi32>
      %cst_32 = arith.constant 0.000000e+00 : f32
      %56 = vector.broadcast %48 : f32 to vector<8x128xf32>
      %57 = vector.broadcast %cst_32 : f32 to vector<8x128xf32>
      %58 = arith.select %55, %56, %57 : vector<8x128xi1>, vector<8x128xf32>
      %59 = vector.broadcast %43 : f32 to vector<8x128xf32>
      %60 = arith.select %53, %59, %58 : vector<8x128xi1>, vector<8x128xf32>
      %61 = vector.broadcast %38 : f32 to vector<8x128xf32>
      %62 = arith.select %51, %61, %60 : vector<8x128xi1>, vector<8x128xf32>
      %63 = vector.shape_cast %62 : vector<8x128xf32> to vector<1x8x128xf32>
      %c0_33 = arith.constant 0 : index
      %c0_34 = arith.constant 0 : index
      %c0_35 = arith.constant 0 : index
      %64 = vector.load %arg4[%c0_33, %c0_34, %c0_35] : memref<1x8x128xf32, #tpu.memory_space<vmem>>, vector<1x8x128xf32>
      tpu.vector_store %arg4[%c0_33, %c0_34, %c0_35], %63 {strides = array<i32>} : memref<1x8x128xf32, #tpu.memory_space<vmem>>, vector<1x8x128xf32>,
    } else {
    }
    return
  }
  func.func @transform_0(%arg0: i32, %arg1: i32) -> (i32, i32) {
    %c1_i32 = arith.constant 1 : i32
    %0 = arith.muli %arg0, %c1_i32 : i32
    %1 = arith.addi %0, %arg1 : i32
    %c0_i32 = arith.constant 0 : i32
    %c0_i32_0 = arith.constant 0 : i32
    return %1, %c0_i32 : i32, i32
  }
  func.func @transform_1(%arg0: i32, %arg1: i32) -> (i32, i32) {
    %c1_i32 = arith.constant 1 : i32
    %0 = arith.muli %arg0, %c1_i32 : i32
    %1 = arith.addi %0, %arg1 : i32
    %c0_i32 = arith.constant 0 : i32
    %c0_i32_0 = arith.constant 0 : i32
    return %1, %c0_i32 : i32, i32
  }
  func.func @transform_2(%arg0: i32, %arg1: i32) -> (i32, i32, i32) {
    %c0_i32 = arith.constant 0 : i32
    %c0_i32_0 = arith.constant 0 : i32
    %c0_i32_1 = arith.constant 0 : i32
    return %arg0, %c0_i32, %c0_i32_0 : i32, i32, i32
  }
}

</mosaic_0001>

<bundles_post_ra>
// kernel: tpu_custom_call.1
= control target key start
LH: loop header
LB: loop body
LE: loop exit
PB: predicated region body
PF: predicated region fallthrough
CT: control target
= control target key end

     0   :  { %7 = vsyncpa [#allocation6], 0  ;;  %s311_s0 = inlined_call_operand.hbm [shape: f32[16,128], index: 0, kind: input, shape index: {}]   ;;  %s312_s1 = inlined_call_operand.hbm [shape: f32[16,128], index: 1, kind: input, shape index: {}]   ;;  %s313_s2 = inlined_call_operand.hbm [shape: f32[1,8,128], index: 2, kind: output, shape index: {}]  }
   0x1   :  { %8 = vsyncpa [#allocation9], 0 }
   0x2   :  { %9 = vsyncpa [#allocation7], 0  ;;  %s18_s11 = sshll.u32 %s311_s0, 4  ;;  %s282_s12 = smov [#allocation5]   ;;  %s19_s11 = int_to_ptr.hbm [resolvable:$true] %s18_s11 }
   0x3   :  { %s20_s13 = sshll.u32 %s282_s12, 4  ;;  %s35_s16 = sshll.u32 %s312_s1, 4  ;;  %s21_s13 = int_to_ptr.vmem [resolvable:$true] %s20_s13  ;;  %s36_s16 = int_to_ptr.hbm [resolvable:$true] %s35_s16 }
   0x4   :  { %s283_s17 = smov 128   ;;  %s284_s18 = smov 8  }
   0x5   :  { %26 = dma.hbm_to_vmem [thread:$0]  %s19_s11, 256, %s21_s13, [#allocation6], %s283_s17, %s283_s17, %s284_s18  }
   0x6   :  { %s285_s19 = smov [#allocation8]  }
   0x7   :  { %s37_s20 = sshll.u32 %s285_s19, 4  ;;  %s38_s20 = int_to_ptr.vmem [resolvable:$true] %s37_s20 }
   0x8   :  { %43 = dma.hbm_to_vmem [thread:$0]  %s36_s16, 256, %s38_s20, [#allocation9], %s283_s17, %s283_s17, %s284_s18  }
   0x9   :  { %276 = dma.done.wait [#allocation6], 256  }
   0xa   :  { %277 = vsyncadd [#allocation6], 4294967040 }
   0xb   :  { %278 = dma.done.wait [#allocation9], 256  }
   0xc   :  { %279 = vsyncadd [#allocation9], 4294967040  ;;  %v66_v0 = vld [vmem:[#allocation5] sm:$0xff]  ;;  %v67_v1 = vld [vmem:[#allocation5 + $0x8] sm:$0xff]  ;;  %v155_v56 = vlaneseq  ;;  %s286_s21 = smov [#allocation10]   ;;  %s174_s26 = sshll.u32 %s313_s2, 4  ;;  %s175_s26 = int_to_ptr.hbm [resolvable:$true] %s174_s26 }
   0xd   :  { %v68_v2 = vld [vmem:[#allocation8] sm:$0xff]  ;;  %v69_v3 = vld [vmem:[#allocation8 + $0x8] sm:$0xff]  ;;  %v71_v4 = vmax.f32 %v67_v1, 1e-09  ;;  %v70_v6 = vmax.f32 %v66_v0, 1e-09 }
   0xe   :  { %v96_v5 = vmul.f32 %v68_v2, %v66_v0  ;;  %v97_v7 = vmul.f32 %v69_v3, %v67_v1  ;;  %v104_v13 = vadd.f32 %v68_v2, %v66_v0  ;;  %v105_v14 = vadd.f32 %v69_v3, %v67_v1  ;;  %s172_s22 = sshll.u32 %s286_s21, 4  ;;  %s173_s22 = int_to_ptr.vmem [resolvable:$true] %s172_s22 }
   0xf   :  { %v73_v8 = vmin.f32 %v71_v4, 1.0  ;;  %v72_v9 = vmin.f32 %v70_v6, 1.0  ;;  %v80_v19 = vsub.f32 1.0, %v68_v2  ;;  %v81_v22 = vsub.f32 1.0, %v69_v3 }
  0x10   :  { %v121_v10 = vadd.f32 %v97_v7, %v96_v5  ;;  %v133_v15 = vadd.f32 %v105_v14, %v104_v13  ;;  %v156_v57 = vshrl.u32 %v155_v56, 7 }
  0x11   :  { %196 = vlog2.f32 %v72_v9  ;;  %v82_v11 = vsub.f32 1.0, %v72_v9  ;;  %v83_v12 = vsub.f32 1.0, %v73_v8 }
  0x12   :  { %122 = vadd.xlane.f32.xlu0 %v121_v10  ;;  %198 = vlog2.f32 %v73_v8  ;;  %vm159_vm0 = vcmp.eq.s32.totalorder %v156_v57, 2  ;;  %vm158_vm1 = vcmp.eq.s32.totalorder %v156_v57, 1  ;;  %vm157_vm2 = vcmp.eq.s32.totalorder %v156_v57, 0 }
  0x13   :  { %200 = vlog2.f32 %v82_v11 }
  0x14   :  { %202 = vlog2.f32 %v83_v12 }
  0x17   :  { %v197_v16 = vpop.eup %196 }
  0x18   :  { %v199_v17 = vpop.eup %198  ;;  %v75_v18 = vmul.f32 0.6931472, %v197_v16 }
  0x19   :  { %v201_v20 = vpop.eup %200  ;;  %v77_v21 = vmul.f32 0.6931472, %v199_v17 }
  0x1a   :  { %v203_v23 = vpop.eup %202  ;;  %134 = vadd.xlane.f32.xlu0 %v133_v15  ;;  %v85_v24 = vmul.f32 0.6931472, %v201_v20  ;;  %v78_v26 = vmul.f32 %v75_v18, %v68_v2 }
  0x1b   :  { %v87_v25 = vmul.f32 0.6931472, %v203_v23  ;;  %v79_v28 = vmul.f32 %v77_v21, %v69_v3 }
  0x1c   :  { %v88_v27 = vmul.f32 %v85_v24, %v80_v19 }
  0x1d   :  { %v89_v29 = vmul.f32 %v87_v25, %v81_v22 }
  0x1e   :  { %v90_v30 = vmul.f32 0.5, %v88_v27 }
  0x1f   :  { %v91_v31 = vmul.f32 0.5, %v89_v29 }
  0x20   :  { %v92_v32 = vadd.f32 %v90_v30, %v78_v26 }
  0x21   :  { %v93_v33 = vadd.f32 %v91_v31, %v79_v28 }
  0x23   :  { %v145_v34 = vadd.f32 %v93_v33, %v92_v32 }
  0x25   :  { %146 = vadd.xlane.f32.xlu1 %v145_v34 }
  0x85   :  { %v123_v35 = vpop.xlane.xlu0 %122 }
  0x86   :  { %v124_v36 = vrot.slane %v123_v35, 4 }
  0x88   :  { %v125_v37 = vadd.f32 %v124_v36, %v123_v35 }
  0x8a   :  { %v126_v38 = vrot.slane %v125_v37, 2 }
  0x8c   :  { %v127_v39 = vadd.f32 %v126_v38, %v125_v37 }
  0x8d   :  { %v135_v40 = vpop.xlane.xlu0 %134 }
  0x8e   :  { %v136_v41 = vrot.slane %v135_v40, 4  ;;  %v128_v42 = vrot.slane %v127_v39, 1 }
  0x90   :  { %v137_v43 = vadd.f32 %v136_v41, %v135_v40  ;;  %v129_v44 = vadd.f32 %v128_v42, %v127_v39 }
  0x92   :  { %v138_v45 = vrot.slane %v137_v43, 2  ;;  %185 = vpush %v129_v44 }
  0x94   :  { %v139_v46 = vadd.f32 %v138_v45, %v137_v43 }
  0x96   :  { %v140_v47 = vrot.slane %v139_v46, 1 }
  0x98   :  { %v147_v48 = vpop.xlane.xlu1 %146  ;;  %v141_v49 = vadd.f32 %v140_v47, %v139_v46 }
  0x99   :  { %v148_v50 = vrot.slane %v147_v48, 4 }
  0x9a   :  { %187 = vpush %v141_v49 }
  0x9b   :  { %v149_v51 = vadd.f32 %v148_v50, %v147_v48 }
  0x9d   :  { %v150_v52 = vrot.slane %v149_v51, 2 }
  0x9f   :  { %v151_v53 = vadd.f32 %v150_v52, %v149_v51 }
  0xa1   :  { %v152_v54 = vrot.slane %v151_v53, 1 }
  0xa3   :  { %v153_v55 = vadd.f32 %v152_v54, %v151_v53 }
  0xa5   :  { %189 = vpush %v153_v55 }
  0xc3   :  { %s186_s0 = spop %185 }
  0xc4   :  { %v164_v61 = vstv %s186_s0 }
  0xcb   :  { %s188_s1 = spop %187 }
  0xcc   :  { %v162_v59 = vstv %s188_s1 }
  0xd6   :  { %s190_s23 = spop %189 }
  0xd7   :  { %v160_v58 = vstv %s190_s23 }
  0xd8   :  { %v161_v60 = vsel %vm159_vm0, %v160_v58, 0.0 }
  0xd9   :  { %v163_v62 = vsel %vm158_vm1, %v162_v59, %v161_v60 }
  0xda   :  { %v165_v63 = vsel %vm157_vm2, %v164_v61, %v163_v62 }
  0xdb   :  { %166 = vst [vmem:[#allocation10] sm:$0xff] %v165_v63 }
  0xdc   :  { %177 = dma.vmem_to_hbm [thread:$0]  %s173_s22, 128, %s175_s26, [#allocation7]  }
  0xdd   :  { %280 = dma.done.wait [#allocation7], 128  }
  0xde   :  { %281 = vsyncadd [#allocation7], 4294967168 }
  0xdf   :  { %182 = vsyncpa [#allocation6], 1 }
  0xe0   :  { %183 = vsyncpa [#allocation9], 1 }
  0xe1   :  { %184 = vsyncpa [#allocation7], 1 }

</bundles_post_ra>
